<compile_context>
chip_gen: v7x
topology: tpu7x:2x2x1
jax: 0.10.0
libtpu: 0.0.40
codegen_flags: <defaults>
</compile_context>

<pallas_src>
import functools

import jax
import jax.numpy as jnp
import numpy as np
from jax.experimental import pallas as pl
from jax.experimental.pallas import tpu as pltpu


def _round_up(x, m):
    return ((x + m - 1) // m) * m


def _conv_kernel(w_ref, x_ref, *rest, shifts, body, halo_pad):
    """One length-tile of the batch-flattened dilated conv.

    w_ref : (G, C_out, C_eff)   weights, one matrix per distinct lane shift
    x_ref : (C_eff, l_tile)     flattened input tile (lane dense)
    h_ref : (C_eff, halo_pad)   head of the NEXT tile (present iff halo_pad > 0)
    o_ref : (C_out, l_tile)     output tile
    """
    if halo_pad:
        h_ref, o_ref = rest
    else:
        (o_ref,) = rest

    x = x_ref[...]
    wmats = [w_ref[g] for g in range(len(shifts))]

    def accumulate(window, width):
        acc = None
        for g, s in enumerate(shifts):
            v = window[:, s:s + width]
            c = jnp.dot(wmats[g], v, preferred_element_type=jnp.float32)
            acc = c if acc is None else acc + c
        return acc

    # Body: output columns whose tap windows lie entirely inside this tile.
    acc = accumulate(x, body)
    if not halo_pad:
        o_ref[...] = acc.astype(o_ref.dtype)
        return
    o_ref[:, :body] = acc.astype(o_ref.dtype)

    # Tail: last halo_pad output columns read up to `halo` columns of the next
    # tile.  Only this small (C_eff, 2*halo_pad) window is assembled.
    tail = jnp.concatenate([x[:, body:], h_ref[...]], axis=-1)
    acc_t = accumulate(tail, halo_pad)
    o_ref[:, body:] = acc_t.astype(o_ref.dtype)


def dilated_conv1d(x, w, *, stride=1, dilation=1, l_tile=2048):
    """Equivalent of nn.Conv1d(nIn, nOut, K, stride, padding=((K-1)//2)*d,
    bias=False, dilation=d) applied to x of shape (N, C_in, L)."""
    n, c_in, length = x.shape
    c_out, c_in_w, ksize = w.shape
    assert c_in == c_in_w
    dtype = x.dtype
    padding = ((ksize - 1) // 2) * dilation
    l_out = (length + 2 * padding - dilation * (ksize - 1) - 1) // stride + 1
    assert l_out > 0, "empty output"

    # ---- Tap plan: per-tap lane shift (in a stride-1 "stream" domain) and a
    # (C_out, C_eff) weight matrix.  Taps sharing a shift are pre-summed so the
    # kernel runs one accumulated MXU matmul per distinct shift.
    if stride == 1:
        c_eff = c_in
        tap_shift = [k * dilation for k in range(ksize)]
        tap_mat = [w[:, :, k] for k in range(ksize)]
        halo = max(tap_shift)
        l_stream = max(l_out + halo, length + padding)
        operand = jnp.pad(x, ((0, 0), (0, 0), (padding, l_stream - padding - length)))
    else:
        # Polyphase: x_pad[t*stride + k*d] == stream_{(k*d)%stride}[t + (k*d)//stride],
        # so the strided conv becomes a stride-1 conv over phase-stacked channels.
        # Only phases actually used by a tap are materialized -> ~1x input HBM
        # traffic instead of the Kx im2col blowup.
        tap_shift = [(k * dilation) // stride for k in range(ksize)]
        tap_phase = [(k * dilation) % stride for k in range(ksize)]
        phases = sorted(set(tap_phase))
        rank = {p: i for i, p in enumerate(phases)}
        c_eff = len(phases) * c_in
        halo = max(tap_shift)
        l_stream = max(l_out + halo, -(-(length + padding) // stride))
        lp = l_stream * stride
        xp = jnp.pad(x, ((0, 0), (0, 0), (padding, lp - padding - length)))
        operand = jnp.concatenate([xp[:, :, p::stride] for p in phases], axis=1)
        tap_mat = []
        for k in range(ksize):
            m = jnp.zeros((c_out, c_eff), w.dtype)
            off = rank[tap_phase[k]] * c_in
            tap_mat.append(m.at[:, off:off + c_in].set(w[:, :, k]))

    shifts = tuple(sorted(set(tap_shift)))
    halo = shifts[-1]
    w_stack = jnp.stack(
        [sum(tap_mat[k] for k in range(ksize) if tap_shift[k] == s) for s in shifts],
        axis=0,
    ).astype(dtype)                                   # (G, C_out, C_eff)

    # ---- Fold batch into the lane axis: each sequence owns an l_stream-wide
    # slot, wide enough that no tap of a *valid* output column crosses slots.
    flat = jnp.transpose(operand, (1, 0, 2)).reshape(c_eff, n * l_stream)
    total_cols = n * l_stream

    # ---- Tile selection: lane-dense, VMEM-budgeted, >=2 grid steps if possible.
    halo_pad = _round_up(halo, 128) if halo else 0
    unit = max(halo_pad, 128)                 # l_tile must be a multiple of this
    min_tile = 2 * halo_pad if halo_pad else 128
    itemsize = jnp.dtype(dtype).itemsize
    budget = 8 * 1024 * 1024                  # double-buffered in/out blocks
    cap = (budget // (2 * (c_eff + c_out) * itemsize)) // unit * unit
    lt = _round_up(max(int(l_tile), 128), unit)
    lt = min(lt, max(cap, min_tile))
    two_tiles = _round_up(-(-total_cols // 2), unit)
    if two_tiles >= min_tile:                 # keep both v7x TensorCores fed
        lt = min(lt, two_tiles)
    lt = min(lt, _round_up(total_cols, unit))
    l_tile = max(lt, min_tile)

    num_tiles = -(-total_cols // l_tile)
    l_main = num_tiles * l_tile
    flat = jnp.pad(flat, ((0, 0), (0, l_main + halo_pad - total_cols)))
    body = l_tile - halo_pad

    in_specs = [
        pl.BlockSpec((len(shifts), c_out, c_eff), lambda j: (0, 0, 0)),
        pl.BlockSpec((c_eff, l_tile), lambda j: (0, j)),
    ]
    args = [w_stack, flat]
    if halo_pad:
        step = l_tile // halo_pad
        # Halo = head of the next tile, read from the SAME array with a second
        # lane-aligned BlockSpec (no wrapper-side gather, no overlap tricks).
        in_specs.append(pl.BlockSpec((c_eff, halo_pad),
                                     lambda j: (0, (j + 1) * step)))
        args.append(flat)

    kernel = functools.partial(
        _conv_kernel, shifts=shifts, body=body, halo_pad=halo_pad)

    out_flat = pl.pallas_call(
        kernel,
        out_shape=jax.ShapeDtypeStruct((c_out, l_main), dtype),
        grid=(num_tiles,),
        in_specs=in_specs,
        out_specs=pl.BlockSpec((c_out, l_tile), lambda j: (0, j)),
        compiler_params=pltpu.CompilerParams(
            dimension_semantics=("parallel",),
            vmem_limit_bytes=32 * 1024 * 1024,
        ),
    )(*args)

    out = out_flat[:, :total_cols].reshape(c_out, n, l_stream)[:, :, :l_out]
    return jnp.transpose(out, (1, 0, 2))


def _reference(x, w, stride, dilation):
    ksize = w.shape[-1]
    pad = ((ksize - 1) // 2) * dilation
    return jax.lax.conv_general_dilated(
        x, w,
        window_strides=(stride,),
        padding=[(pad, pad)],
        rhs_dilation=(dilation,),
        dimension_numbers=("NCH", "OIH", "NCH"),
    )


if __name__ == "__main__":
    # Module config (mirrors DilatedConv(nIn, nOut, kSize, stride=1, d=2)).
    nIn, nOut, kSize, stride, d = 4, 8, 3, 1, 2
    batch, length = 2, 16

    key = jax.random.PRNGKey(0)
    kx, kw = jax.random.split(key)
    x = jax.random.normal(kx, (batch, nIn, length), dtype=jnp.float32)
    w = jax.random.normal(kw, (nOut, nIn, kSize), dtype=jnp.float32) * 0.1

    out = jax.block_until_ready(dilated_conv1d(x, w, stride=stride, dilation=d))
    ref = _reference(x, w, stride, d)
    assert out.shape == ref.shape, (out.shape, ref.shape)
    np.testing.assert_allclose(np.asarray(out), np.asarray(ref), rtol=1e-5, atol=1e-5)

    # Multi-tile length path (halo crossing tile boundaries).
    kx2, _ = jax.random.split(kw)
    x2 = jax.random.normal(kx2, (batch, nIn, 300), dtype=jnp.float32)
    out2 = jax.block_until_ready(dilated_conv1d(x2, w, stride=1, dilation=d, l_tile=128))
    np.testing.assert_allclose(np.asarray(out2), np.asarray(_reference(x2, w, 1, d)),
                               rtol=1e-5, atol=1e-5)

    # stride > 1 (polyphase path, no im2col blowup).
    out3 = jax.block_until_ready(dilated_conv1d(x, w, stride=2, dilation=1))
    np.testing.assert_allclose(np.asarray(out3), np.asarray(_reference(x, w, 2, 1)),
                               rtol=1e-5, atol=1e-5)

    print("KERNEL_OK")
</pallas_src>

<mosaic_0001>
module attributes {stable_mosaic.version = 11 : i64} {
  func.func @_conv_kernel(%arg0: i32, %arg1: memref<3x8x4xf32, #tpu.memory_space<vmem>>, %arg2: memref<4x256xf32, #tpu.memory_space<vmem>>, %arg3: memref<4x128xf32, #tpu.memory_space<vmem>>, %arg4: memref<8x256xf32, #tpu.memory_space<vmem>>) attributes {dimension_semantics = [#tpu.dimension_semantics<parallel>], iteration_bounds = array<i64: 1>, scalar_prefetch = 0 : i64, scratch_operands = 0 : i64, tpu.core_type = #tpu.core_type<tc>, window_params = [{pipeline_mode = #tpu.pipeline_mode<synchronous>, transform_indices = @transform_0, window_bounds = array<i64: 3, 8, 4>}, {transform_indices = @transform_1, window_bounds = array<i64: 4, 256>}, {transform_indices = @transform_2, window_bounds = array<i64: 4, 128>}, {transform_indices = @transform_3, window_bounds = array<i64: 8, 256>}]} {
    %c0 = arith.constant 0 : index
    %c0_0 = arith.constant 0 : index
    %0 = vector.load %arg2[%c0, %c0_0] : memref<4x256xf32, #tpu.memory_space<vmem>>, vector<4x256xf32>
    %c0_1 = arith.constant 0 : index
    %c0_2 = arith.constant 0 : index
    %c0_3 = arith.constant 0 : index
    %1 = vector.load %arg1[%c0_1, %c0_2, %c0_3] : memref<3x8x4xf32, #tpu.memory_space<vmem>>, vector<1x8x4xf32>
    %2 = vector.shape_cast %1 : vector<1x8x4xf32> to vector<8x4xf32>
    %c1 = arith.constant 1 : index
    %c0_4 = arith.constant 0 : index
    %c0_5 = arith.constant 0 : index
    %3 = vector.load %arg1[%c1, %c0_4, %c0_5] : memref<3x8x4xf32, #tpu.memory_space<vmem>>, vector<1x8x4xf32>
    %4 = vector.shape_cast %3 : vector<1x8x4xf32> to vector<8x4xf32>
    %c2 = arith.constant 2 : index
    %c0_6 = arith.constant 0 : index
    %c0_7 = arith.constant 0 : index
    %5 = vector.load %arg1[%c2, %c0_6, %c0_7] : memref<3x8x4xf32, #tpu.memory_space<vmem>>, vector<1x8x4xf32>
    %6 = vector.shape_cast %5 : vector<1x8x4xf32> to vector<8x4xf32>
    %7 = vector.extract_strided_slice %0 {offsets = [0, 0], sizes = [4, 128], strides = [1, 1]} : vector<4x256xf32> to vector<4x128xf32>
    %cst = arith.constant dense<0.000000e+00> : vector<8x128xf32>
    %8 = tpu.matmul %2, %7, %cst {dimension_numbers = #tpu.dot_dimension_numbers<[1], [0], [0], [1], [0, 0, 1, 1], [], []>} : vector<8x4xf32>, vector<4x128xf32>, vector<8x128xf32> -> vector<8x128xf32>
    %9 = vector.extract_strided_slice %0 {offsets = [0, 2], sizes = [4, 128], strides = [1, 1]} : vector<4x256xf32> to vector<4x128xf32>
    %cst_8 = arith.constant dense<0.000000e+00> : vector<8x128xf32>
    %10 = tpu.matmul %4, %9, %cst_8 {dimension_numbers = #tpu.dot_dimension_numbers<[1], [0], [0], [1], [0, 0, 1, 1], [], []>} : vector<8x4xf32>, vector<4x128xf32>, vector<8x128xf32> -> vector<8x128xf32>
    %11 = arith.addf %8, %10 : vector<8x128xf32>
    %12 = vector.extract_strided_slice %0 {offsets = [0, 4], sizes = [4, 128], strides = [1, 1]} : vector<4x256xf32> to vector<4x128xf32>
    %cst_9 = arith.constant dense<0.000000e+00> : vector<8x128xf32>
    %13 = tpu.matmul %6, %12, %cst_9 {dimension_numbers = #tpu.dot_dimension_numbers<[1], [0], [0], [1], [0, 0, 1, 1], [], []>} : vector<8x4xf32>, vector<4x128xf32>, vector<8x128xf32> -> vector<8x128xf32>
    %14 = arith.addf %11, %13 : vector<8x128xf32>
    %c0_10 = arith.constant 0 : index
    %c0_11 = arith.constant 0 : index
    %15 = vector.load %arg4[%c0_10, %c0_11] : memref<8x256xf32, #tpu.memory_space<vmem>>, vector<8x128xf32>
    tpu.vector_store %arg4[%c0_10, %c0_11], %14 {strides = array<i32>} : memref<8x256xf32, #tpu.memory_space<vmem>>, vector<8x128xf32>,
    %16 = vector.extract_strided_slice %0 {offsets = [0, 128], sizes = [4, 128], strides = [1, 1]} : vector<4x256xf32> to vector<4x128xf32>
    %c0_12 = arith.constant 0 : index
    %c0_13 = arith.constant 0 : index
    %17 = vector.load %arg3[%c0_12, %c0_13] : memref<4x128xf32, #tpu.memory_space<vmem>>, vector<4x128xf32>
    %18 = tpu.concatenate %16, %17 in 1 : vector<4x128xf32>, vector<4x128xf32> -> vector<4x256xf32>
    %19 = vector.extract_strided_slice %18 {offsets = [0, 0], sizes = [4, 128], strides = [1, 1]} : vector<4x256xf32> to vector<4x128xf32>
    %cst_14 = arith.constant dense<0.000000e+00> : vector<8x128xf32>
    %20 = tpu.matmul %2, %19, %cst_14 {dimension_numbers = #tpu.dot_dimension_numbers<[1], [0], [0], [1], [0, 0, 1, 1], [], []>} : vector<8x4xf32>, vector<4x128xf32>, vector<8x128xf32> -> vector<8x128xf32>
    %21 = vector.extract_strided_slice %18 {offsets = [0, 2], sizes = [4, 128], strides = [1, 1]} : vector<4x256xf32> to vector<4x128xf32>
    %cst_15 = arith.constant dense<0.000000e+00> : vector<8x128xf32>
    %22 = tpu.matmul %4, %21, %cst_15 {dimension_numbers = #tpu.dot_dimension_numbers<[1], [0], [0], [1], [0, 0, 1, 1], [], []>} : vector<8x4xf32>, vector<4x128xf32>, vector<8x128xf32> -> vector<8x128xf32>
    %23 = arith.addf %20, %22 : vector<8x128xf32>
    %24 = vector.extract_strided_slice %18 {offsets = [0, 4], sizes = [4, 128], strides = [1, 1]} : vector<4x256xf32> to vector<4x128xf32>
    %cst_16 = arith.constant dense<0.000000e+00> : vector<8x128xf32>
    %25 = tpu.matmul %6, %24, %cst_16 {dimension_numbers = #tpu.dot_dimension_numbers<[1], [0], [0], [1], [0, 0, 1, 1], [], []>} : vector<8x4xf32>, vector<4x128xf32>, vector<8x128xf32> -> vector<8x128xf32>
    %26 = arith.addf %23, %25 : vector<8x128xf32>
    %c0_17 = arith.constant 0 : index
    %c128 = arith.constant 128 : index
    %27 = vector.load %arg4[%c0_17, %c128] : memref<8x256xf32, #tpu.memory_space<vmem>>, vector<8x128xf32>
    tpu.vector_store %arg4[%c0_17, %c128], %26 {strides = array<i32>} : memref<8x256xf32, #tpu.memory_space<vmem>>, vector<8x128xf32>,
    return
  }
  func.func @transform_0(%arg0: i32) -> (i32, i32, i32) {
    %c0_i32 = arith.constant 0 : i32
    %c0_i32_0 = arith.constant 0 : i32
    %c0_i32_1 = arith.constant 0 : i32
    %c0_i32_2 = arith.constant 0 : i32
    return %c0_i32, %c0_i32_0, %c0_i32_1 : i32, i32, i32
  }
  func.func @transform_1(%arg0: i32) -> (i32, i32) {
    %c0_i32 = arith.constant 0 : i32
    %c0_i32_0 = arith.constant 0 : i32
    return %c0_i32, %arg0 : i32, i32
  }
  func.func @transform_2(%arg0: i32) -> (i32, i32) {
    %c1_i32 = arith.constant 1 : i32
    %0 = arith.addi %arg0, %c1_i32 : i32
    %c2_i32 = arith.constant 2 : i32
    %1 = arith.muli %0, %c2_i32 : i32
    %c0_i32 = arith.constant 0 : i32
    %c0_i32_0 = arith.constant 0 : i32
    return %c0_i32, %1 : i32, i32
  }
  func.func @transform_3(%arg0: i32) -> (i32, i32) {
    %c0_i32 = arith.constant 0 : i32
    %c0_i32_0 = arith.constant 0 : i32
    return %c0_i32, %arg0 : i32, i32
  }
}

</mosaic_0001>

<bundles_post_ra>
// kernel: tpu_custom_call.1
= control target key start
LH: loop header
LB: loop body
LE: loop exit
PB: predicated region body
PF: predicated region fallthrough
CT: control target
= control target key end

     0   :  { %s627_s16 = smov 126   ;;  %v628_v3 = vmov 0.0   ;;  %s697_s0 = inlined_call_operand.vmem [shape: f32[3,8,4], index: 0, kind: input, shape index: {}]   ;;  %s698_s1 = inlined_call_operand.vmem [shape: f32[4,384], index: 1, kind: input, shape index: {}]   ;;  %s699_s2 = inlined_call_operand.vmem [shape: f32[4,384], index: 2, kind: input, shape index: {}]   ;;  %s700_s3 = inlined_call_operand.hbm [shape: f32[8,256], index: 3, kind: output, shape index: {}]  }
   0x1   :  { %v37_v0 = vld [vmem:[%s698_s1] sm:$0xff]  ;;  %v540_v1 = vld [vmem:[%s699_s2 + $0x8] sm:$0xf]  ;;  %559 = vmatprep.subr.mxu0 %v628_v3  ;;  %574 = vmatprep.subr.mxu1 %v628_v3 }
   0x2   :  { %45 = vrot.lane.b32.xlu0 %v37_v0, %s627_s16  ;;  %288 = vrot.lane.b32.xlu1 %v540_v1, %s627_s16  ;;  %v44_v2 = vcombine.high %v37_v0, %v37_v0 }
   0x3   :  { %8 = vsyncpa [#allocation3], 0  ;;  %vm629_vm0 = vmmov 0   ;;  %s630_s17 = smov 124   ;;  %vm49_vm1 = vcmask 1031168   ;;  %vm55_vm2 = vcmask 1043456  }
   0x4   :  { %561 = vmatprep.mubr.msk.f32.mxu0 %vm629_vm0, %v628_v3  ;;  %576 = vmatprep.mubr.msk.f32.mxu1 %vm629_vm0, %v628_v3  ;;  %v532_v7 = vld [vmem:[%s697_s0 + $0x8] sm:$0xff]  ;;  %vm51_vm3 = vcmask 31744   ;;  %vm207_vm4 = vcmask 1014784   ;;  %v38_v13 = vld [vmem:[%s697_s0] sm:$0xff]  ;;  %v533_v16 = vld [vmem:[%s697_s0 + $0x10] sm:$0xff]  ;;  %s631_s22 = smov [#allocation2]  }
   0x5   :  { %s518_s23 = sshll.u32 %s631_s22, 4  ;;  %s519_s23 = int_to_ptr.vmem [resolvable:$true] %s518_s23 }
   0x6   :  { %47 = vrot.lane.b32.xlu0 %v44_v2, %s627_s16  ;;  %203 = vrot.lane.b32.xlu1 %v37_v0, %s630_s17  ;;  %s603_s24 = scalar_lea.vmem %s519_s23, 256  ;;  %p608_p1 = scmp.lt.s32.totalorder %s519_s23, %s519_s23 }
   0x7   :  { %p604_p0 = scmp.ne.s32.totalorder %s519_s23, %s603_s24  ;;  %p609_p2 = scmp.lt.s32.totalorder %s603_s24, %s603_s24 }
   0x9   :  { %p610_p3 = por %p609_p2, %p608_p1 }
   0xa   :  { %205 = vrot.lane.b32.xlu0 %v44_v2, %s630_s17  ;;  %435 = vrot.lane.b32.xlu1 %v540_v1, %s630_s17 }
   0xb   :  { %p611_p4 = pnand %p610_p3, %p604_p0 }
  0x74   :  { %v46_v4 = vpop.permute.xlu0 %45  ;;  %v289_v5 = vpop.permute.xlu1 %288 }
  0x78   :  { %v48_v6 = vpop.permute.xlu0 %47  ;;  %v204_v10 = vpop.permute.xlu1 %203 }
  0x79   :  { %v50_v8 = vsel %vm49_vm1, %v46_v4, %v48_v6  ;;  %v290_v9 = vsel %vm49_vm1, %v48_v6, %v289_v5 }
  0x7a   :  { %560 = vmatpush3.msk.msra.mxu0 %vm55_vm2, %v50_v8  ;;  %575 = vmatpush3.msk.msra.mxu1 %vm55_vm2, %v290_v9 }
  0x7b   :  { %562 = vmatmul.mubr.msk.f32.vlgmr.msra.gmra.mrb[0].mxu0 %vm51_vm3, %v532_v7  ;;  %564 = vmatprep.subr.mxu0 %v628_v3 }
  0x7c   :  { %577 = vmatmul.mubr.msk.f32.vlgmr.msra.gmra.mrb[0].mxu1 %vm51_vm3, %v532_v7  ;;  %579 = vmatprep.subr.mxu1 %v628_v3  ;;  %v206_v11 = vpop.permute.xlu0 %205  ;;  %v436_v12 = vpop.permute.xlu1 %435 }
  0x7d   :  { %565 = vmatpush3.msk.msra.mxu0 %vm55_vm2, %v37_v0  ;;  %580 = vmatpush3.msk.msra.mxu1 %vm55_vm2, %v44_v2  ;;  %v208_v14 = vsel %vm207_vm4, %v204_v10, %v206_v11  ;;  %v437_v15 = vsel %vm207_vm4, %v206_v11, %v436_v12 }
  0x7e   :  { %566 = vmatprep.mubr.msk.f32.mxu0 %vm629_vm0, %v628_v3  ;;  %569 = vmatprep.subr.mxu0 %v628_v3 }
  0x7f   :  { %581 = vmatprep.mubr.msk.f32.mxu1 %vm629_vm0, %v628_v3  ;;  %584 = vmatprep.subr.mxu1 %v628_v3 }
  0x83   :  { %567 = vmatmul.mubr.msk.f32.vlgmr.msra.gmra.mrb[0].mxu0 %vm51_vm3, %v38_v13 }
  0x84   :  { %570 = vmatpush3.msk.msra.mxu0 %vm55_vm2, %v208_v14  ;;  %582 = vmatmul.mubr.msk.f32.vlgmr.msra.gmra.mrb[0].mxu1 %vm51_vm3, %v38_v13 }
  0x85   :  { %585 = vmatpush3.msk.msra.mxu1 %vm55_vm2, %v437_v15  ;;  %571 = vmatprep.mubr.msk.f32.mxu0 %vm629_vm0, %v628_v3 }
  0x86   :  { %586 = vmatprep.mubr.msk.f32.mxu1 %vm629_vm0, %v628_v3 }
  0x8b   :  { %572 = vmatmul.mubr.msk.f32.vlgmr.msra.gmra.mrb[0].mxu0 %vm51_vm3, %v533_v16 }
  0x8c   :  { %587 = vmatmul.mubr.msk.f32.vlgmr.msra.gmra.mrb[0].mxu1 %vm51_vm3, %v533_v16 }
 0x15e   :  { %v280_v17 = vpop.f32.mrb[0].mxu0 }
 0x15f   :  { %285 = vst [vmem:[#allocation2] sm:$0xff] %v280_v17  ;;  %v506_v18 = vpop.f32.mrb[0].mxu1  ;;  %v573_v19 = vpop.f32.mrb[1].mxu0 }
 0x160   :  { %511 = vst [vmem:[#allocation2 + $0x8] sm:$0xff] %v506_v18  ;;  %v588_v20 = vpop.f32.mrb[1].mxu1 }
 0x161   :  { %614 = shalt.err (!%p611_p4)
}
 0x162   :  { %s615_s26 = scalar_lea.hbm %s700_s3, 256 }
 0x163   :  { %p616_p5 = scmp.ne.s32.totalorder %s700_s3, %s615_s26  ;;  %p619_p6 = scmp.lt.u32.totalorder %s615_s26, %s700_s3 }
 0x165   :  { %p621_p7 = pnand %p619_p6, %p616_p5 }
 0x167   :  { %624 = shalt.err (!%p621_p7)
}
 0x168   :  { %521 = dma.vmem_to_hbm [thread:$0]  %s519_s23, 256, %s700_s3, [#allocation3]  }
 0x169   :  { %625 = dma.done.wait [#allocation3], 256  }
 0x16a   :  { %626 = vsyncadd [#allocation3], 4294967040 }
 0x16b   :  { %525 = vsyncpa [#allocation3], 1 }

</bundles_post_ra>
